<compile_context>
chip_gen: v7x
topology: tpu7x:2x2x1
jax: 0.10.0
libtpu: 0.0.40
codegen_flags: <defaults>
</compile_context>

<pallas_src>
import functools

import jax
import jax.numpy as jnp
from jax.experimental import pallas as pl
from jax.experimental.pallas import tpu as pltpu


def _cdiv(a, b):
    return -(-a // b)


def _round_up(x, m):
    return _cdiv(x, m) * m


# ----------------------------- kernels --------------------------------------


def _gap1d_kernel_full(x_ref, o_ref, *, inv_len):
    # Whole length axis in one block: one f32 reduce, scale by true 1/L, cast.
    s = jnp.sum(x_ref[...], axis=-1, keepdims=True, dtype=jnp.float32)
    o_ref[...] = (s * inv_len).astype(o_ref.dtype)


def _gap1d_kernel_chunked(x_ref, o_ref, acc_ref, *, inv_len, true_len, l_tile,
                          needs_mask):
    # x_ref:   (rows_tile, l_tile)    current length chunk
    # o_ref:   (rows_tile, 1)         output block (resident across k)
    # acc_ref: (rows_tile, 128) f32   lane-dense accumulator (VPU-only inner loop)
    k = pl.program_id(1)

    @pl.when(k == 0)
    def _():
        acc_ref[...] = jnp.zeros_like(acc_ref)

    rows = x_ref.shape[0]
    acc = acc_ref[...]
    if needs_mask:
        # Hoisted once; mask out columns >= true L (Pallas does not zero-fill
        # out-of-bounds block reads).
        lane_ids = jax.lax.broadcasted_iota(jnp.int32, (rows, 128), 1)
        base = k * l_tile
    for j in range(l_tile // 128):
        cols = x_ref[:, j * 128:(j + 1) * 128].astype(jnp.float32)
        if needs_mask:
            col_idx = base + j * 128 + lane_ids
            cols = jnp.where(col_idx < true_len, cols, 0.0)
        acc = acc + cols
    acc_ref[...] = acc

    @pl.when(k == pl.num_programs(1) - 1)
    def _():
        # Single cross-lane reduce + scale by the *true* length, only once.
        s = jnp.sum(acc_ref[...], axis=-1, keepdims=True)
        o_ref[...] = (s * inv_len).astype(o_ref.dtype)


# ----------------------------- wrapper ---------------------------------------


def _vmem_budget():
    """(per-buffer tile bytes, vmem_limit_bytes), generation-aware."""
    try:
        info = pltpu.get_tpu_info()
        cap = getattr(info, "vmem_capacity_bytes", 0) or 0
    except Exception:
        cap = 0
    if cap >= 100 * 1024 * 1024:        # v5e / v6e: 128 MiB physical VMEM
        return 16 * 1024 * 1024, 96 * 1024 * 1024
    # v7x (64 MiB per TensorCore) or unknown: conservative, safe everywhere.
    return 8 * 1024 * 1024, 48 * 1024 * 1024


def gap1d(x, *, max_rows_tile=512, tile_bytes=None, vmem_limit_bytes=None):
    """x: (N, C, L) -> (N, C); mean over L (AdaptiveAvgPool1d(1) + flatten)."""
    N, C, L = x.shape
    R = N * C
    itemsize = jnp.dtype(x.dtype).itemsize
    sublane = max(8, 32 // itemsize)      # 8 (f32) / 16 (bf16) / 32 (int8/fp8)

    d_tile, d_limit = _vmem_budget()
    if tile_bytes is None:
        tile_bytes = d_tile
    if vmem_limit_bytes is None:
        vmem_limit_bytes = d_limit

    # ---- rows tiling over the flattened (N*C) axis --------------------------
    # Cap so the "parallel" rows axis has >= 2 blocks whenever possible
    # (keeps both v7x TensorCores busy); always sublane-aligned.
    rows_cap = max(sublane,
                   min(_round_up(max_rows_tile, sublane),
                       _round_up(_cdiv(R, 2), sublane)))
    rows_floor = min(rows_cap, 64)        # 64 is a multiple of 8 / 16 / 32

    # Largest sublane-aligned row count whose full-L tile fits the budget.
    full_l_rows = (tile_bytes // max(1, L * itemsize)) // sublane * sublane

    x2 = x.reshape(R, L)                  # metadata-only reshape (contiguous)
    inv_len = 1.0 / L

    if L <= 128 or full_l_rows >= rows_floor:
        # ---- full-L path: contiguous DMA per block, no reduction grid axis.
        rows_tile = (max(sublane, min(rows_cap, full_l_rows))
                     if L > 128 else rows_cap)
        grid = (_cdiv(R, rows_tile),)
        out = pl.pallas_call(
            functools.partial(_gap1d_kernel_full, inv_len=inv_len),
            out_shape=jax.ShapeDtypeStruct((R, 1), x.dtype),
            grid_spec=pltpu.PrefetchScalarGridSpec(
                num_scalar_prefetch=0,
                grid=grid,
                in_specs=[pl.BlockSpec((rows_tile, L), lambda i: (i, 0))],
                out_specs=pl.BlockSpec((rows_tile, 1), lambda i: (i, 0)),
            ),
            compiler_params=pltpu.CompilerParams(
                dimension_semantics=("parallel",),
                vmem_limit_bytes=vmem_limit_bytes,
            ),
            cost_estimate=pl.CostEstimate(
                flops=R * L, transcendentals=0,
                bytes_accessed=R * L * itemsize + R * itemsize),
        )(x2)
    else:
        # ---- chunked-L fallback: lane-dense f32 accumulator, in-kernel
        #      tail-column masking, reduction axis last in the grid.
        rows_tile = rows_cap
        l_tile = max(128, (tile_bytes // (rows_tile * itemsize)) // 128 * 128)
        grid_l = _cdiv(L, l_tile)
        grid = (_cdiv(R, rows_tile), grid_l)
        needs_mask = (L % l_tile) != 0

        spec_kwargs = {}
        if rows_tile * l_tile * itemsize < (1 << 20) and grid_l >= 3:
            spec_kwargs = dict(pipeline_mode=pl.Buffered(3))
        try:
            in_spec = pl.BlockSpec((rows_tile, l_tile), lambda i, k: (i, k),
                                   **spec_kwargs)
        except TypeError:  # pipeline_mode unsupported -> default 2-deep pipeline
            in_spec = pl.BlockSpec((rows_tile, l_tile), lambda i, k: (i, k))

        out = pl.pallas_call(
            functools.partial(_gap1d_kernel_chunked, inv_len=inv_len,
                              true_len=L, l_tile=l_tile, needs_mask=needs_mask),
            out_shape=jax.ShapeDtypeStruct((R, 1), x.dtype),
            grid_spec=pltpu.PrefetchScalarGridSpec(
                num_scalar_prefetch=0,
                grid=grid,
                in_specs=[in_spec],
                out_specs=pl.BlockSpec((rows_tile, 1), lambda i, k: (i, 0)),
                scratch_shapes=[pltpu.VMEM((rows_tile, 128), jnp.float32)],
            ),
            compiler_params=pltpu.CompilerParams(
                dimension_semantics=("parallel", "arbitrary"),
                vmem_limit_bytes=vmem_limit_bytes,
            ),
            cost_estimate=pl.CostEstimate(
                flops=R * L, transcendentals=0,
                bytes_accessed=R * L * itemsize + R * itemsize),
        )(x2)

    return out[:, 0].reshape(N, C)


if __name__ == "__main__":
    key = jax.random.PRNGKey(0)

    # Shapes implied by the module's forward: (batch, channels, length).
    N, C, L = 2, 4, 16
    x = jax.random.normal(key, (N, C, L), dtype=jnp.float32)
    out = jax.block_until_ready(gap1d(x))
    ref = jnp.mean(x, axis=-1)
    assert out.shape == (N, C), out.shape
    assert jnp.allclose(out, ref, atol=1e-6, rtol=1e-6), "mismatch (full-L path)"

    # Full-L path with ragged row count (R=15 -> 2 row blocks, partial tail).
    x3 = jax.random.normal(jax.random.PRNGKey(2), (3, 5, 200), dtype=jnp.float32)
    out3 = jax.block_until_ready(gap1d(x3))
    assert out3.shape == (3, 5), out3.shape
    assert jnp.allclose(out3, jnp.mean(x3, axis=-1), atol=1e-5, rtol=1e-5), \
        "mismatch (ragged rows, full-L path)"

    # Force the chunked-L path (tiny budget): exercises the lane-dense
    # accumulator, in-kernel tail-column masking, and deeper input pipeline.
    x2 = jax.random.normal(jax.random.PRNGKey(1), (2, 3, 300), dtype=jnp.float32)
    out2 = jax.block_until_ready(gap1d(x2, tile_bytes=4096))
    assert out2.shape == (2, 3), out2.shape
    assert jnp.allclose(out2, jnp.mean(x2, axis=-1), atol=1e-5, rtol=1e-5), \
        "mismatch (chunked-L path)"

    print("KERNEL_OK")
</pallas_src>

<mosaic_0001>
module attributes {stable_mosaic.version = 11 : i64} {
  func.func @_gap1d_kernel_full(%arg0: i32, %arg1: memref<8x16xf32, #tpu.memory_space<vmem>>, %arg2: memref<8x1xf32, #tpu.memory_space<vmem>>) attributes {dimension_semantics = [#tpu.dimension_semantics<parallel>], iteration_bounds = array<i64: 1>, scalar_prefetch = 0 : i64, scratch_operands = 0 : i64, tpu.core_type = #tpu.core_type<tc>, window_params = [{transform_indices = @transform_0, window_bounds = array<i64: 8, 16>}, {transform_indices = @transform_1, window_bounds = array<i64: 8, 1>}]} {
    %c0 = arith.constant 0 : index
    %c0_0 = arith.constant 0 : index
    %0 = vector.load %arg1[%c0, %c0_0] : memref<8x16xf32, #tpu.memory_space<vmem>>, vector<8x16xf32>
    %cst = arith.constant dense<0.000000e+00> : vector<8xf32>
    %1 = vector.multi_reduction <add>, %0, %cst [1] : vector<8x16xf32> to vector<8xf32>
    %2 = vector.shape_cast %1 : vector<8xf32> to vector<8x1xf32>
    %cst_1 = arith.constant 6.250000e-02 : f32
    %3 = vector.broadcast %cst_1 : f32 to vector<8x1xf32>
    %4 = arith.mulf %2, %3 : vector<8x1xf32>
    %c0_2 = arith.constant 0 : index
    %c0_3 = arith.constant 0 : index
    %5 = vector.load %arg2[%c0_2, %c0_3] : memref<8x1xf32, #tpu.memory_space<vmem>>, vector<8x1xf32>
    tpu.vector_store %arg2[%c0_2, %c0_3], %4 {strides = array<i32>} : memref<8x1xf32, #tpu.memory_space<vmem>>, vector<8x1xf32>,
    return
  }
  func.func @transform_0(%arg0: i32) -> (i32, i32) {
    %c0_i32 = arith.constant 0 : i32
    %c0_i32_0 = arith.constant 0 : i32
    return %arg0, %c0_i32 : i32, i32
  }
  func.func @transform_1(%arg0: i32) -> (i32, i32) {
    %c0_i32 = arith.constant 0 : i32
    %c0_i32_0 = arith.constant 0 : i32
    return %arg0, %c0_i32 : i32, i32
  }
}

</mosaic_0001>

<bundles_post_ra>
// kernel: tpu_custom_call.1
= control target key start
LH: loop header
LB: loop body
LE: loop exit
PB: predicated region body
PF: predicated region fallthrough
CT: control target
= control target key end

     0   :  { %6 = vsyncpa [#allocation3], 0  ;;  %s58_s6 = smov [#allocation2]   ;;  %s84_s0 = inlined_call_operand.hbm [shape: f32[8,16], index: 0, kind: input, shape index: {}]   ;;  %s85_s1 = inlined_call_operand.vmem [shape: f32[8,1], index: 1, kind: output, shape index: {}]  }
   0x1   :  { %s13_s7 = sshll.u32 %s58_s6, 4  ;;  %s34_s10 = scalar_lea.hbm %s84_s0, 128  ;;  %s14_s7 = int_to_ptr.vmem [resolvable:$true] %s13_s7 }
   0x2   :  { %p35_p0 = scmp.ne.s32.totalorder %s84_s0, %s34_s10  ;;  %p38_p1 = scmp.lt.u32.totalorder %s34_s10, %s84_s0 }
   0x4   :  { %p40_p2 = pnand %p38_p1, %p35_p0 }
   0x6   :  { %43 = shalt.err (!%p40_p2)
}
   0x7   :  { %s44_s15 = scalar_lea.vmem %s14_s7, 128  ;;  %p49_p4 = scmp.lt.s32.totalorder %s14_s7, %s14_s7 }
   0x8   :  { %p45_p3 = scmp.ne.s32.totalorder %s14_s7, %s44_s15  ;;  %p50_p5 = scmp.lt.s32.totalorder %s44_s15, %s44_s15 }
   0xa   :  { %p51_p6 = por %p50_p5, %p49_p4 }
   0xc   :  { %p52_p7 = pnand %p51_p6, %p45_p3 }
   0xe   :  { %55 = shalt.err (!%p52_p7)
}
   0xf   :  { %16 = dma.hbm_to_vmem [thread:$0]  %s84_s0, 128, %s14_s7, [#allocation3]  }
  0x10   :  { %56 = dma.done.wait [#allocation3], 128  }
  0x11   :  { %57 = vsyncadd [#allocation3], 4294967168  ;;  %vm21_vm0 = vcmask 130048   ;;  %v20_v0 = vld [vmem:[#allocation2] sm:$0xff]  ;;  %vm26_vm1 = vcmask 7168  }
  0x12   :  { %v22_v1 = vsel %vm21_vm0, %v20_v0, 0.0 }
  0x13   :  { %23 = vadd.xlane.f32.xlu0 %v22_v1 }
  0xa0   :  { %v24_v2 = vpop.xlane.xlu0 %23 }
  0xa1   :  { %v25_v3 = vmul.f32 0.0625, %v24_v2 }
  0xa3   :  { %27 = vst.msk [vmem:[%s85_s1] sm:$0xff] %vm26_vm1, %v25_v3 }
  0xa4   :  { %32 = vsyncpa [#allocation3], 1 }

</bundles_post_ra>
